<compile_context>
chip_gen: v7x
topology: tpu7x:2x2x1
jax: 0.10.0
libtpu: 0.0.40
codegen_flags: <defaults>
</compile_context>

<pallas_src>
import jax
import jax.numpy as jnp
from jax.experimental import pallas as pl
from jax.experimental.pallas import tpu as pltpu


def _round_up(x, m):
    return (x + m - 1) // m * m


def _double_dense_kernel(x_ref, w1_ref, b1_ref, w2_ref, b2_ref, w3_ref, b3_ref, o_ref):
    # dense1 + relu  (bf16 MXU matmul, f32 accumulation; bias/ReLU in f32 on VPU)
    h1 = jnp.dot(x_ref[...], w1_ref[...], preferred_element_type=jnp.float32)
    h1 = jnp.maximum(h1 + b1_ref[...], 0.0)
    # dense2 + relu
    h2 = jnp.dot(h1.astype(w2_ref.dtype), w2_ref[...], preferred_element_type=jnp.float32)
    h2 = jnp.maximum(h2 + b2_ref[...], 0.0)
    # dense3 (no activation)
    out = jnp.dot(h2.astype(w3_ref.dtype), w3_ref[...], preferred_element_type=jnp.float32)
    o_ref[...] = (out + b3_ref[...]).astype(o_ref.dtype)


def double_dense(x, w1, b1, w2, b2, w3, b3, *, block_m=256, compute_dtype=jnp.bfloat16):
    """x: (B, C, H, W) float32. Returns (B, output_channels) float32."""
    B = x.shape[0]
    x_flat = x.reshape(B, -1)
    in_features = x_flat.shape[1]
    h1_f, h2_f, out_f = w1.shape[1], w2.shape[1], w3.shape[1]

    LANE = 128
    in_p = _round_up(in_features, LANE)
    h1_p = _round_up(h1_f, LANE)
    h2_p = _round_up(h2_f, LANE)
    out_p = _round_up(out_f, LANE)

    # Batch tile: multiple of 8 sublanes, capped at block_m; pad B up to a multiple.
    tm = min(block_m, _round_up(B, 8))
    b_p = _round_up(B, tm)

    f32 = jnp.float32
    # Zero-pad everything to lane/sublane-friendly shapes (padded hidden columns
    # get zero weight + zero bias -> ReLU(0)=0, so they never pollute real outputs).
    xp = jnp.zeros((b_p, in_p), compute_dtype).at[:B, :in_features].set(
        x_flat.astype(compute_dtype))
    w1p = jnp.zeros((in_p, h1_p), compute_dtype).at[:in_features, :h1_f].set(
        w1.astype(compute_dtype))
    w2p = jnp.zeros((h1_p, h2_p), compute_dtype).at[:h1_f, :h2_f].set(w2.astype(compute_dtype))
    w3p = jnp.zeros((h2_p, out_p), compute_dtype).at[:h2_f, :out_f].set(w3.astype(compute_dtype))
    b1p = jnp.zeros((1, h1_p), f32).at[0, :h1_f].set(b1.astype(f32))
    b2p = jnp.zeros((1, h2_p), f32).at[0, :h2_f].set(b2.astype(f32))
    b3p = jnp.zeros((1, out_p), f32).at[0, :out_f].set(b3.astype(f32))

    itemsize = jnp.dtype(compute_dtype).itemsize
    cost = pl.CostEstimate(
        flops=2 * b_p * (in_p * h1_p + h1_p * h2_p + h2_p * out_p),
        transcendentals=0,
        bytes_accessed=(xp.size + w1p.size + w2p.size + w3p.size) * itemsize
        + (b1p.size + b2p.size + b3p.size) * 4
        + b_p * out_p * x.dtype.itemsize,
    )

    out_padded = pl.pallas_call(
        _double_dense_kernel,
        out_shape=jax.ShapeDtypeStruct((b_p, out_p), x.dtype),
        grid=(b_p // tm,),
        in_specs=[
            pl.BlockSpec((tm, in_p), lambda i: (i, 0)),    # x tile: pipelined per grid step
            pl.BlockSpec((in_p, h1_p), lambda i: (0, 0)),  # weights/biases: resident in VMEM
            pl.BlockSpec((1, h1_p), lambda i: (0, 0)),
            pl.BlockSpec((h1_p, h2_p), lambda i: (0, 0)),
            pl.BlockSpec((1, h2_p), lambda i: (0, 0)),
            pl.BlockSpec((h2_p, out_p), lambda i: (0, 0)),
            pl.BlockSpec((1, out_p), lambda i: (0, 0)),
        ],
        out_specs=pl.BlockSpec((tm, out_p), lambda i: (i, 0)),
        compiler_params=pltpu.CompilerParams(dimension_semantics=("parallel",)),
        cost_estimate=cost,
    )(xp, w1p, b1p, w2p, b2p, w3p, b3p)

    # Slice the padded batch rows / lane-padded output columns back off.
    return out_padded[:B, :out_f]


if __name__ == "__main__":
    # Small shapes consistent with the module's forward:
    # x: (batch=2, channels=4, spatial=16x16) -> flattened in_channels = 4*16*16 = 1024
    B, C, H, W = 2, 4, 16, 16
    in_channels = C * H * W           # 1024
    hidden_neurons = 32
    output_channels = 10

    key = jax.random.PRNGKey(0)
    kx, k1, k2, k3, kb1, kb2, kb3 = jax.random.split(key, 7)

    x = jax.random.normal(kx, (B, C, H, W), dtype=jnp.float32)

    # Deterministic parameter init (PyTorch-Linear-like uniform bounds), stored
    # transposed as (in_features, out_features).
    def init_linear(kw, kb, fan_in, fan_out):
        bound = 1.0 / (fan_in ** 0.5)
        w = jax.random.uniform(kw, (fan_in, fan_out), jnp.float32, -bound, bound)
        b = jax.random.uniform(kb, (fan_out,), jnp.float32, -bound, bound)
        return w, b

    w1, b1 = init_linear(k1, kb1, in_channels, hidden_neurons)
    w2, b2 = init_linear(k2, kb2, hidden_neurons, hidden_neurons // 2)
    w3, b3 = init_linear(k3, kb3, hidden_neurons // 2, output_channels)

    out = double_dense(x, w1, b1, w2, b2, w3, b3)
    out = jax.block_until_ready(out)
    assert out.shape == (B, output_channels)

    # Reference forward (same math as the PyTorch module), at matching and at
    # full precision.
    def ref_forward(dt):
        xf = x.reshape(B, -1)
        h = jnp.dot(xf.astype(dt), w1.astype(dt), preferred_element_type=jnp.float32) + b1
        h = jnp.maximum(h, 0.0)
        h = jnp.dot(h.astype(dt), w2.astype(dt), preferred_element_type=jnp.float32) + b2
        h = jnp.maximum(h, 0.0)
        return jnp.dot(h.astype(dt), w3.astype(dt), preferred_element_type=jnp.float32) + b3

    ref_bf16 = ref_forward(jnp.bfloat16)   # same compute dtype as the kernel
    ref_f32 = ref_forward(jnp.float32)     # full-precision PyTorch-equivalent forward
    assert jnp.allclose(out, ref_bf16, atol=1e-4, rtol=1e-4)
    assert jnp.allclose(out, ref_f32, atol=5e-2, rtol=5e-2)

    print("KERNEL_OK")
</pallas_src>

<mosaic_0001>
module attributes {stable_mosaic.version = 11 : i64} {
  func.func @_double_dense_kernel(%arg0: i32, %arg1: memref<8x1024xbf16, #tpu.memory_space<vmem>>, %arg2: memref<1024x128xbf16, #tpu.memory_space<vmem>>, %arg3: memref<1x128xf32, #tpu.memory_space<vmem>>, %arg4: memref<128x128xbf16, #tpu.memory_space<vmem>>, %arg5: memref<1x128xf32, #tpu.memory_space<vmem>>, %arg6: memref<128x128xbf16, #tpu.memory_space<vmem>>, %arg7: memref<1x128xf32, #tpu.memory_space<vmem>>, %arg8: memref<8x128xf32, #tpu.memory_space<vmem>>) attributes {dimension_semantics = [#tpu.dimension_semantics<parallel>], iteration_bounds = array<i64: 1>, scalar_prefetch = 0 : i64, scratch_operands = 0 : i64, tpu.core_type = #tpu.core_type<tc>, window_params = [{transform_indices = @transform_0, window_bounds = array<i64: 8, 1024>}, {pipeline_mode = #tpu.pipeline_mode<synchronous>, transform_indices = @transform_1, window_bounds = array<i64: 1024, 128>}, {pipeline_mode = #tpu.pipeline_mode<synchronous>, transform_indices = @transform_2, window_bounds = array<i64: 1, 128>}, {pipeline_mode = #tpu.pipeline_mode<synchronous>, transform_indices = @transform_3, window_bounds = array<i64: 128, 128>}, {pipeline_mode = #tpu.pipeline_mode<synchronous>, transform_indices = @transform_4, window_bounds = array<i64: 1, 128>}, {pipeline_mode = #tpu.pipeline_mode<synchronous>, transform_indices = @transform_5, window_bounds = array<i64: 128, 128>}, {pipeline_mode = #tpu.pipeline_mode<synchronous>, transform_indices = @transform_6, window_bounds = array<i64: 1, 128>}, {transform_indices = @transform_7, window_bounds = array<i64: 8, 128>}]} {
    %c0 = arith.constant 0 : index
    %c0_0 = arith.constant 0 : index
    %0 = vector.load %arg1[%c0, %c0_0] : memref<8x1024xbf16, #tpu.memory_space<vmem>>, vector<8x1024xbf16>
    %c0_1 = arith.constant 0 : index
    %c0_2 = arith.constant 0 : index
    %1 = vector.load %arg2[%c0_1, %c0_2] : memref<1024x128xbf16, #tpu.memory_space<vmem>>, vector<1024x128xbf16>
    %cst = arith.constant dense<0.000000e+00> : vector<8x128xf32>
    %2 = tpu.matmul %0, %1, %cst {dimension_numbers = #tpu.dot_dimension_numbers<[1], [0], [0], [1], [0, 0, 1, 1], [], []>} : vector<8x1024xbf16>, vector<1024x128xbf16>, vector<8x128xf32> -> vector<8x128xf32>
    %c0_3 = arith.constant 0 : index
    %c0_4 = arith.constant 0 : index
    %3 = vector.load %arg3[%c0_3, %c0_4] : memref<1x128xf32, #tpu.memory_space<vmem>>, vector<1x128xf32>
    %4 = vector.broadcast %3 : vector<1x128xf32> to vector<8x128xf32>
    %5 = arith.addf %2, %4 : vector<8x128xf32>
    %cst_5 = arith.constant 0.000000e+00 : f32
    %6 = vector.broadcast %cst_5 : f32 to vector<8x128xf32>
    %7 = arith.maximumf %5, %6 : vector<8x128xf32>
    %8 = arith.truncf %7 : vector<8x128xf32> to vector<8x128xbf16>
    %c0_6 = arith.constant 0 : index
    %c0_7 = arith.constant 0 : index
    %9 = vector.load %arg4[%c0_6, %c0_7] : memref<128x128xbf16, #tpu.memory_space<vmem>>, vector<128x128xbf16>
    %cst_8 = arith.constant dense<0.000000e+00> : vector<8x128xf32>
    %10 = tpu.matmul %8, %9, %cst_8 {dimension_numbers = #tpu.dot_dimension_numbers<[1], [0], [0], [1], [0, 0, 1, 1], [], []>} : vector<8x128xbf16>, vector<128x128xbf16>, vector<8x128xf32> -> vector<8x128xf32>
    %c0_9 = arith.constant 0 : index
    %c0_10 = arith.constant 0 : index
    %11 = vector.load %arg5[%c0_9, %c0_10] : memref<1x128xf32, #tpu.memory_space<vmem>>, vector<1x128xf32>
    %12 = vector.broadcast %11 : vector<1x128xf32> to vector<8x128xf32>
    %13 = arith.addf %10, %12 : vector<8x128xf32>
    %cst_11 = arith.constant 0.000000e+00 : f32
    %14 = vector.broadcast %cst_11 : f32 to vector<8x128xf32>
    %15 = arith.maximumf %13, %14 : vector<8x128xf32>
    %16 = arith.truncf %15 : vector<8x128xf32> to vector<8x128xbf16>
    %c0_12 = arith.constant 0 : index
    %c0_13 = arith.constant 0 : index
    %17 = vector.load %arg6[%c0_12, %c0_13] : memref<128x128xbf16, #tpu.memory_space<vmem>>, vector<128x128xbf16>
    %cst_14 = arith.constant dense<0.000000e+00> : vector<8x128xf32>
    %18 = tpu.matmul %16, %17, %cst_14 {dimension_numbers = #tpu.dot_dimension_numbers<[1], [0], [0], [1], [0, 0, 1, 1], [], []>} : vector<8x128xbf16>, vector<128x128xbf16>, vector<8x128xf32> -> vector<8x128xf32>
    %c0_15 = arith.constant 0 : index
    %c0_16 = arith.constant 0 : index
    %19 = vector.load %arg7[%c0_15, %c0_16] : memref<1x128xf32, #tpu.memory_space<vmem>>, vector<1x128xf32>
    %20 = vector.broadcast %19 : vector<1x128xf32> to vector<8x128xf32>
    %21 = arith.addf %18, %20 : vector<8x128xf32>
    %c0_17 = arith.constant 0 : index
    %c0_18 = arith.constant 0 : index
    %22 = vector.load %arg8[%c0_17, %c0_18] : memref<8x128xf32, #tpu.memory_space<vmem>>, vector<8x128xf32>
    tpu.vector_store %arg8[%c0_17, %c0_18], %21 {strides = array<i32>} : memref<8x128xf32, #tpu.memory_space<vmem>>, vector<8x128xf32>,
    return
  }
  func.func @transform_0(%arg0: i32) -> (i32, i32) {
    %c0_i32 = arith.constant 0 : i32
    %c0_i32_0 = arith.constant 0 : i32
    return %arg0, %c0_i32 : i32, i32
  }
  func.func @transform_1(%arg0: i32) -> (i32, i32) {
    %c0_i32 = arith.constant 0 : i32
    %c0_i32_0 = arith.constant 0 : i32
    %c0_i32_1 = arith.constant 0 : i32
    return %c0_i32, %c0_i32_0 : i32, i32
  }
  func.func @transform_2(%arg0: i32) -> (i32, i32) {
    %c0_i32 = arith.constant 0 : i32
    %c0_i32_0 = arith.constant 0 : i32
    %c0_i32_1 = arith.constant 0 : i32
    return %c0_i32, %c0_i32_0 : i32, i32
  }
  func.func @transform_3(%arg0: i32) -> (i32, i32) {
    %c0_i32 = arith.constant 0 : i32
    %c0_i32_0 = arith.constant 0 : i32
    %c0_i32_1 = arith.constant 0 : i32
    return %c0_i32, %c0_i32_0 : i32, i32
  }
  func.func @transform_4(%arg0: i32) -> (i32, i32) {
    %c0_i32 = arith.constant 0 : i32
    %c0_i32_0 = arith.constant 0 : i32
    %c0_i32_1 = arith.constant 0 : i32
    return %c0_i32, %c0_i32_0 : i32, i32
  }
  func.func @transform_5(%arg0: i32) -> (i32, i32) {
    %c0_i32 = arith.constant 0 : i32
    %c0_i32_0 = arith.constant 0 : i32
    %c0_i32_1 = arith.constant 0 : i32
    return %c0_i32, %c0_i32_0 : i32, i32
  }
  func.func @transform_6(%arg0: i32) -> (i32, i32) {
    %c0_i32 = arith.constant 0 : i32
    %c0_i32_0 = arith.constant 0 : i32
    %c0_i32_1 = arith.constant 0 : i32
    return %c0_i32, %c0_i32_0 : i32, i32
  }
  func.func @transform_7(%arg0: i32) -> (i32, i32) {
    %c0_i32 = arith.constant 0 : i32
    %c0_i32_0 = arith.constant 0 : i32
    return %arg0, %c0_i32 : i32, i32
  }
}

</mosaic_0001>

<bundles_post_ra>
// kernel: tpu_custom_call.1
= control target key start
LH: loop header
LB: loop body
LE: loop exit
PB: predicated region body
PF: predicated region fallthrough
CT: control target
= control target key end

     0   :  { %12 = vsyncpa [#allocation3], 0  ;;  %s1633_s0 = inlined_call_operand.hbm [shape: bf16[8,1024], index: 0, kind: input, shape index: {}]   ;;  %s1634_s1 = inlined_call_operand.hbm [shape: bf16[1024,128], index: 1, kind: input, shape index: {}]   ;;  %s1635_s2 = inlined_call_operand.vmem [shape: f32[1,128], index: 2, kind: input, shape index: {}]   ;;  %s1636_s3 = inlined_call_operand.hbm [shape: bf16[128,128], index: 3, kind: input, shape index: {}]   ;;  %s1637_s4 = inlined_call_operand.vmem [shape: f32[1,128], index: 4, kind: input, shape index: {}]   ;;  %s1638_s5 = inlined_call_operand.hbm [shape: bf16[128,128], index: 5, kind: input, shape index: {}]   ;;  %s1639_s6 = inlined_call_operand.vmem [shape: f32[1,128], index: 6, kind: input, shape index: {}]   ;;  %s1640_s7 = inlined_call_operand.hbm [shape: f32[8,128], index: 7, kind: output, shape index: {}]  }
   0x1   :  { %13 = vsyncpa [#allocation6], 0 }
   0x2   :  { %14 = vsyncpa [#allocation9], 0 }
   0x3   :  { %15 = vsyncpa [#allocation4], 0  ;;  %s1488_s24 = smov [#allocation5]   ;;  %s1370_s28 = scalar_lea.hbm %s1634_s1, 8192 }
   0x4   :  { %s31_s25 = sshll.u32 %s1488_s24, 4  ;;  %p1371_p0 = scmp.ne.s32.totalorder %s1634_s1, %s1370_s28  ;;  %s32_s25 = int_to_ptr.vmem [resolvable:$true] %s31_s25 }
   0x5   :  { %p1374_p1 = scmp.lt.u32.totalorder %s1370_s28, %s1634_s1 }
   0x7   :  { %p1376_p2 = pnand %p1374_p1, %p1371_p0 }
   0x9   :  { %1379 = shalt.err (!%p1376_p2)
}
   0xa   :  { %s1380_s10 = scalar_lea.vmem %s32_s25, 8192  ;;  %p1385_p4 = scmp.lt.s32.totalorder %s32_s25, %s32_s25 }
   0xb   :  { %p1381_p3 = scmp.ne.s32.totalorder %s32_s25, %s1380_s10  ;;  %p1386_p5 = scmp.lt.s32.totalorder %s1380_s10, %s1380_s10 }
   0xd   :  { %p1387_p6 = por %p1386_p5, %p1385_p4 }
   0xf   :  { %p1388_p7 = pnand %p1387_p6, %p1381_p3 }
  0x11   :  { %1391 = shalt.err (!%p1388_p7)
}
  0x12   :  { %s1489_s11 = smov 64   ;;  %s1490_s12 = smov 4  }
  0x13   :  { %37 = dma.hbm_to_vmem [thread:$0]  %s1634_s1, 8192, %s32_s25, [#allocation6], %s1489_s11, %s1489_s11, %s1490_s12  }
  0x14   :  { %s1491_s15 = smov [#allocation2]   ;;  %s1492_s17 = smov [#allocation7]  }
  0x15   :  { %s22_s16 = sshll.u32 %s1491_s15, 4  ;;  %s45_s18 = sshll.u32 %s1492_s17, 4  ;;  %s23_s16 = int_to_ptr.vmem [resolvable:$true] %s22_s16  ;;  %s46_s18 = int_to_ptr.vmem [resolvable:$true] %s45_s18 }
  0x16   :  { %s1392_s21 = scalar_lea.hbm %s1633_s0, 512 }
  0x17   :  { %p1393_p8 = scmp.ne.s32.totalorder %s1633_s0, %s1392_s21  ;;  %p1396_p9 = scmp.lt.u32.totalorder %s1392_s21, %s1633_s0 }
  0x19   :  { %p1398_p10 = pnand %p1396_p9, %p1393_p8 }
  0x1b   :  { %1401 = shalt.err (!%p1398_p10)
}
  0x1c   :  { %s1402_s1 = scalar_lea.vmem %s23_s16, 512  ;;  %p1407_p12 = scmp.lt.s32.totalorder %s23_s16, %s23_s16 }
  0x1d   :  { %p1403_p11 = scmp.ne.s32.totalorder %s23_s16, %s1402_s1  ;;  %p1408_p13 = scmp.lt.s32.totalorder %s1402_s1, %s1402_s1 }
  0x1f   :  { %p1409_p0 = por %p1408_p13, %p1407_p12 }
  0x21   :  { %p1410_p1 = pnand %p1409_p0, %p1403_p11 }
  0x23   :  { %1413 = shalt.err (!%p1410_p1)
}
  0x24   :  { %25 = dma.hbm_to_vmem [thread:$0]  %s1633_s0, 512, %s23_s16, [#allocation3]  }
  0x25   :  { %s1414_s30 = scalar_lea.hbm %s1636_s3, 1024 }
  0x26   :  { %p1415_p2 = scmp.ne.s32.totalorder %s1636_s3, %s1414_s30  ;;  %p1418_p3 = scmp.lt.u32.totalorder %s1414_s30, %s1636_s3 }
  0x28   :  { %p1420_p4 = pnand %p1418_p3, %p1415_p2 }
  0x2a   :  { %1423 = shalt.err (!%p1420_p4)
}
  0x2b   :  { %s1424_s14 = scalar_lea.vmem %s46_s18, 1024  ;;  %p1429_p6 = scmp.lt.s32.totalorder %s46_s18, %s46_s18 }
  0x2c   :  { %p1425_p5 = scmp.ne.s32.totalorder %s46_s18, %s1424_s14  ;;  %p1430_p7 = scmp.lt.s32.totalorder %s1424_s14, %s1424_s14 }
  0x2e   :  { %p1431_p8 = por %p1430_p7, %p1429_p6 }
  0x30   :  { %p1432_p9 = pnand %p1431_p8, %p1425_p5 }
  0x32   :  { %1435 = shalt.err (!%p1432_p9)
}
  0x33   :  { %51 = dma.hbm_to_vmem [thread:$0]  %s1636_s3, 1024, %s46_s18, [#allocation6], %s1489_s11, %s1489_s11, %s1490_s12  }
  0x34   :  { %s1493_s16 = smov [#allocation8]   ;;  %s1436_s21 = scalar_lea.hbm %s1638_s5, 1024 }
  0x35   :  { %s59_s17 = sshll.u32 %s1493_s16, 4  ;;  %p1437_p10 = scmp.ne.s32.totalorder %s1638_s5, %s1436_s21  ;;  %s60_s17 = int_to_ptr.vmem [resolvable:$true] %s59_s17 }
  0x36   :  { %p1440_p11 = scmp.lt.u32.totalorder %s1436_s21, %s1638_s5 }
  0x38   :  { %p1442_p12 = pnand %p1440_p11, %p1437_p10 }
  0x3a   :  { %1445 = shalt.err (!%p1442_p12)
}
  0x3b   :  { %s1446_s1 = scalar_lea.vmem %s60_s17, 1024  ;;  %p1451_p0 = scmp.lt.s32.totalorder %s60_s17, %s60_s17 }
  0x3c   :  { %p1447_p13 = scmp.ne.s32.totalorder %s60_s17, %s1446_s1  ;;  %p1452_p1 = scmp.lt.s32.totalorder %s1446_s1, %s1446_s1 }
  0x3e   :  { %p1453_p2 = por %p1452_p1, %p1451_p0 }
  0x40   :  { %p1454_p3 = pnand %p1453_p2, %p1447_p13 }
  0x42   :  { %1457 = shalt.err (!%p1454_p3)
}
  0x43   :  { %65 = dma.hbm_to_vmem [thread:$0]  %s1638_s5, 1024, %s60_s17, [#allocation9], %s1489_s11, %s1489_s11, %s1490_s12  }
  0x44   :  { %1480 = dma.done.wait [#allocation3], 512  }
  0x45   :  { %1481 = vsyncadd [#allocation3], 4294966784 }
  0x46   :  { %1482 = dma.done.wait [#allocation6], 9216  }
  0x47   :  { %1483 = vsyncadd [#allocation6], 4294958080 }
  0x48   :  { %1484 = dma.done.wait [#allocation9], 1024  }
  0x49   :  { %1485 = vsyncadd [#allocation9], 4294966272  ;;  %v1282_v0 = vld [vmem:[#allocation5 + $0x40] sm:$0xff]   ;;  %v1286_v4 = vld [vmem:[#allocation5 + $0x48] sm:$0xff]   ;;  %vm1495_vm0 = vmmov 0   ;;  %s1496_s28 = smov [#allocation10]  }
  0x4a   :  { %v1283_v1 = vld [vmem:[#allocation5 + $0xc0] sm:$0xff]   ;;  %1127 = vmatprep.subr.bf16.mxu0 %v1282_v0  ;;  %v1287_v5 = vld [vmem:[#allocation5 + $0xc8] sm:$0xff]   ;;  %v1290_v8 = vld [vmem:[#allocation5 + $0x50] sm:$0xff]   ;;  %s1025_s29 = sshll.u32 %s1496_s28, 4  ;;  %s1026_s29 = int_to_ptr.vmem [resolvable:$true] %s1025_s29 }
  0x4b   :  { %v1284_v2 = vld [vmem:[#allocation5] sm:$0xff]   ;;  %1149 = vmatprep.subr.bf16.mxu1 %v1283_v1  ;;  %v1288_v6 = vld [vmem:[#allocation5 + $0x8] sm:$0xff]   ;;  %v1291_v9 = vld [vmem:[#allocation5 + $0xd0] sm:$0xff]   ;;  %p1463_p5 = scmp.lt.s32.totalorder %s1026_s29, %s1026_s29 }
  0x4c   :  { %v1285_v3 = vld [vmem:[#allocation5 + $0x80] sm:$0xff]   ;;  %1128 = vmatpush3.bf16.msra.mxu0 %v1284_v2  ;;  %v1289_v7 = vld [vmem:[#allocation5 + $0x88] sm:$0xff]   ;;  %v1292_v10 = vld [vmem:[#allocation5 + $0x10] sm:$0xff]  }
  0x4d   :  { %1150 = vmatpush3.bf16.msra.mxu1 %v1285_v3  ;;  %1129 = vmatprep.subr.bf16.mxu0 %v1286_v4  ;;  %v1293_v11 = vld [vmem:[#allocation5 + $0x90] sm:$0xff]   ;;  %v1294_v12 = vld [vmem:[#allocation5 + $0x58] sm:$0xff]   ;;  %v1298_v16 = vld [vmem:[#allocation5 + $0x60] sm:$0xff]  }
  0x4e   :  { %1151 = vmatprep.subr.bf16.mxu1 %v1287_v5  ;;  %v1295_v13 = vld [vmem:[#allocation5 + $0xd8] sm:$0xff]   ;;  %v1299_v17 = vld [vmem:[#allocation5 + $0xe0] sm:$0xff]   ;;  %v1302_v20 = vld [vmem:[#allocation5 + $0x68] sm:$0xff]  }
  0x4f   :  { %v1296_v14 = vld [vmem:[#allocation5 + $0x18] sm:$0xff]   ;;  %v1300_v18 = vld [vmem:[#allocation5 + $0x20] sm:$0xff]   ;;  %v1303_v21 = vld [vmem:[#allocation5 + $0xe8] sm:$0xff]  }
  0x50   :  { %1130 = vmatpush3.bf16.msra.mxu0 %v1288_v6  ;;  %v1297_v15 = vld [vmem:[#allocation5 + $0x98] sm:$0xff]   ;;  %v1301_v19 = vld [vmem:[#allocation5 + $0xa0] sm:$0xff]   ;;  %v1304_v22 = vld [vmem:[#allocation5 + $0x28] sm:$0xff]  }
  0x51   :  { %1152 = vmatpush3.bf16.msra.mxu1 %v1289_v7  ;;  %1131 = vmatprep.subr.bf16.mxu0 %v1290_v8  ;;  %v1305_v23 = vld [vmem:[#allocation5 + $0xa8] sm:$0xff]   ;;  %v1306_v24 = vld [vmem:[#allocation5 + $0x70] sm:$0xff]   ;;  %v1310_v28 = vld [vmem:[#allocation5 + $0x78] sm:$0xff]  }
  0x52   :  { %1153 = vmatprep.subr.bf16.mxu1 %v1291_v9  ;;  %v1307_v25 = vld [vmem:[#allocation5 + $0xf0] sm:$0xff]   ;;  %v1311_v29 = vld [vmem:[#allocation5 + $0xf8] sm:$0xff]   ;;  %v81_v32 = vld [vmem:[#allocation2] sm:$0xff] }
  0x53   :  { %v1308_v26 = vld [vmem:[#allocation5 + $0x30] sm:$0xff]   ;;  %v1312_v30 = vld [vmem:[#allocation5 + $0x38] sm:$0xff]   ;;  %v82_v33 = vld [vmem:[#allocation2 + $0x8] sm:$0xff]  ;;  %v1037_v34 = vcombine.low %v81_v32, %v81_v32  ;;  %v1038_v35 = vcombine.high %v81_v32, %v81_v32 }
  0x54   :  { %1132 = vmatpush3.bf16.msra.mxu0 %v1292_v10  ;;  %v1309_v27 = vld [vmem:[#allocation5 + $0xb0] sm:$0xff]   ;;  %v1313_v31 = vld [vmem:[#allocation5 + $0xb8] sm:$0xff]   ;;  %v1039_v36 = vcombine.low %v82_v33, %v82_v33  ;;  %v1040_v37 = vcombine.high %v82_v33, %v82_v33  ;;  %v1318_v38 = vld [vmem:[#allocation5 + $0x140] sm:$0xff]  }
  0x55   :  { %1154 = vmatpush3.bf16.msra.mxu1 %v1293_v11  ;;  %1133 = vmatprep.subr.bf16.mxu0 %v1294_v12  ;;  %v1319_v39 = vld [vmem:[#allocation5 + $0x1c0] sm:$0xff]   ;;  %v1322_v42 = vld [vmem:[#allocation5 + $0x148] sm:$0xff]   ;;  %v1326_v46 = vld [vmem:[#allocation5 + $0x150] sm:$0xff]  }
  0x56   :  { %1155 = vmatprep.subr.bf16.mxu1 %v1295_v13  ;;  %664 = vmatprep.mubr.bf16.mxu0 %v1038_v35  ;;  %v1320_v40 = vld [vmem:[#allocation5 + $0x100] sm:$0xff]   ;;  %v1323_v43 = vld [vmem:[#allocation5 + $0x1c8] sm:$0xff]   ;;  %v1327_v47 = vld [vmem:[#allocation5 + $0x1d0] sm:$0xff]   ;;  %v1494_v13 = vmov 0.0  }
  0x57   :  { %704 = vmatprep.mubr.bf16.mxu1 %v1040_v37  ;;  %v1321_v41 = vld [vmem:[#allocation5 + $0x180] sm:$0xff]   ;;  %v1324_v44 = vld [vmem:[#allocation5 + $0x108] sm:$0xff]   ;;  %v1328_v48 = vld [vmem:[#allocation5 + $0x110] sm:$0xff]  }
  0x58   :  { %1134 = vmatpush3.bf16.msra.mxu0 %v1296_v14  ;;  %v1325_v45 = vld [vmem:[#allocation5 + $0x188] sm:$0xff]   ;;  %v1329_v49 = vld [vmem:[#allocation5 + $0x190] sm:$0xff]   ;;  %v1330_v50 = vld [vmem:[#allocation5 + $0x158] sm:$0xff]  }
  0x59   :  { %1156 = vmatpush3.bf16.msra.mxu1 %v1297_v15  ;;  %1135 = vmatprep.subr.bf16.mxu0 %v1298_v16  ;;  %v1331_v51 = vld [vmem:[#allocation5 + $0x1d8] sm:$0xff]   ;;  %v1334_v54 = vld [vmem:[#allocation5 + $0x160] sm:$0xff]   ;;  %v1338_v58 = vld [vmem:[#allocation5 + $0x168] sm:$0xff]  }
  0x5a   :  { %1157 = vmatprep.subr.bf16.mxu1 %v1299_v17  ;;  %v1332_v52 = vld [vmem:[#allocation5 + $0x118] sm:$0xff]   ;;  %v1335_v55 = vld [vmem:[#allocation5 + $0x1e0] sm:$0xff]   ;;  %v1339_v59 = vld [vmem:[#allocation5 + $0x1e8] sm:$0xff]  }
  0x5b   :  { %v1333_v53 = vld [vmem:[#allocation5 + $0x198] sm:$0xff]   ;;  %v1336_v56 = vld [vmem:[#allocation5 + $0x120] sm:$0xff]   ;;  %v1340_v60 = vld [vmem:[#allocation5 + $0x128] sm:$0xff]  }
  0x5c   :  { %1136 = vmatpush3.bf16.msra.mxu0 %v1300_v18  ;;  %v1337_v57 = vld [vmem:[#allocation5 + $0x1a0] sm:$0xff]   ;;  %v1341_v61 = vld [vmem:[#allocation5 + $0x1a8] sm:$0xff]   ;;  %v1342_v62 = vld [vmem:[#allocation5 + $0x170] sm:$0xff]  }
  0x5d   :  { %1158 = vmatpush3.bf16.msra.mxu1 %v1301_v19  ;;  %1137 = vmatprep.subr.bf16.mxu0 %v1302_v20  ;;  %v1343_v63 = vld [vmem:[#allocation5 + $0x1f0] sm:$0xff]   ;;  %v1346_v2 = vld [vmem:[#allocation5 + $0x178] sm:$0xff]   ;;  %v1354_v12 = vld [vmem:[#allocation7] sm:$0xff]  }
  0x5e   :  { %1159 = vmatprep.subr.bf16.mxu1 %v1303_v21  ;;  %v1344_v0 = vld [vmem:[#allocation5 + $0x130] sm:$0xff]   ;;  %v1347_v3 = vld [vmem:[#allocation5 + $0x1f8] sm:$0xff]   ;;  %v1355_v14 = vld [vmem:[#allocation7 + $0x8] sm:$0xff]  }
  0x5f   :  { %v1345_v1 = vld [vmem:[#allocation5 + $0x1b0] sm:$0xff]   ;;  %v1348_v4 = vld [vmem:[#allocation5 + $0x138] sm:$0xff]   ;;  %v1358_v17 = vld [vmem:[#allocation7 + $0x20] sm:$0xff]  }
  0x60   :  { %1138 = vmatpush3.bf16.msra.mxu0 %v1304_v22  ;;  %v1349_v5 = vld [vmem:[#allocation5 + $0x1b8] sm:$0xff]   ;;  %v83_v6 = vld [vmem:[#allocation2 + $0x10] sm:$0xff]  ;;  %v1359_v18 = vld [vmem:[#allocation7 + $0x28] sm:$0xff]  }
  0x61   :  { %1160 = vmatpush3.bf16.msra.mxu1 %v1305_v23  ;;  %1139 = vmatprep.subr.bf16.mxu0 %v1306_v24  ;;  %v1041_v7 = vcombine.low %v83_v6, %v83_v6  ;;  %v1042_v8 = vcombine.high %v83_v6, %v83_v6  ;;  %v84_v9 = vld [vmem:[#allocation2 + $0x18] sm:$0xff]  ;;  %v1356_v15 = vld [vmem:[#allocation7 + $0x10] sm:$0xff]   ;;  %v1362_v21 = vld [vmem:[#allocation8] sm:$0xff]  }
  0x62   :  { %1161 = vmatprep.subr.bf16.mxu1 %v1307_v25  ;;  %v1043_v10 = vcombine.low %v84_v9, %v84_v9  ;;  %v1044_v11 = vcombine.high %v84_v9, %v84_v9  ;;  %v1357_v16 = vld [vmem:[#allocation7 + $0x18] sm:$0xff]   ;;  %v1360_v19 = vld [vmem:[#allocation7 + $0x30] sm:$0xff]   ;;  %v1363_v22 = vld [vmem:[#allocation8 + $0x8] sm:$0xff]  }
  0x63   :  { %v1361_v20 = vld [vmem:[#allocation7 + $0x38] sm:$0xff]   ;;  %v1364_v23 = vld [vmem:[#allocation8 + $0x10] sm:$0xff]   ;;  %v1366_v25 = vld [vmem:[#allocation8 + $0x20] sm:$0xff]  }
  0x64   :  { %1140 = vmatpush3.bf16.msra.mxu0 %v1308_v26  ;;  %v1365_v24 = vld [vmem:[#allocation8 + $0x18] sm:$0xff]   ;;  %v1367_v26 = vld [vmem:[#allocation8 + $0x28] sm:$0xff]  }
  0x65   :  { %1162 = vmatpush3.bf16.msra.mxu1 %v1309_v27  ;;  %1141 = vmatprep.subr.bf16.mxu0 %v1310_v28 }
  0x66   :  { %1163 = vmatprep.subr.bf16.mxu1 %v1311_v29  ;;  %v1036_v29 = vld [vmem:[%s1635_s2] ss:$0 sm:$0xff] }
  0x68   :  { %1142 = vmatpush3.bf16.msra.mxu0 %v1312_v30 }
  0x69   :  { %1164 = vmatpush3.bf16.msra.mxu1 %v1313_v31  ;;  %1171 = vmatprep.subr.bf16.mxu0 %v1318_v38 }
  0x6a   :  { %1193 = vmatprep.subr.bf16.mxu1 %v1319_v39 }
  0x6b   :  { %665 = vmatmul.mubr.bf16.vlgmr.msra.gmra.mrb[0].mxu0 %v1037_v34 }
  0x6c   :  { %705 = vmatmul.mubr.bf16.vlgmr.msra.gmra.mrb[0].mxu1 %v1039_v36  ;;  %1172 = vmatpush3.bf16.msra.mxu0 %v1320_v40 }
  0x6d   :  { %1194 = vmatpush3.bf16.msra.mxu1 %v1321_v41  ;;  %1173 = vmatprep.subr.bf16.mxu0 %v1322_v42 }
  0x6e   :  { %1195 = vmatprep.subr.bf16.mxu1 %v1323_v43  ;;  %744 = vmatprep.mubr.bf16.mxu0 %v1042_v8 }
  0x6f   :  { %784 = vmatprep.mubr.bf16.mxu1 %v1044_v11 }
  0x70   :  { %1174 = vmatpush3.bf16.msra.mxu0 %v1324_v44 }
  0x71   :  { %1196 = vmatpush3.bf16.msra.mxu1 %v1325_v45  ;;  %1175 = vmatprep.subr.bf16.mxu0 %v1326_v46 }
  0x72   :  { %1197 = vmatprep.subr.bf16.mxu1 %v1327_v47 }
  0x74   :  { %1176 = vmatpush3.bf16.msra.mxu0 %v1328_v48 }
  0x75   :  { %1198 = vmatpush3.bf16.msra.mxu1 %v1329_v49  ;;  %1177 = vmatprep.subr.bf16.mxu0 %v1330_v50 }
  0x76   :  { %1199 = vmatprep.subr.bf16.mxu1 %v1331_v51 }
  0x78   :  { %1178 = vmatpush3.bf16.msra.mxu0 %v1332_v52 }
  0x79   :  { %1200 = vmatpush3.bf16.msra.mxu1 %v1333_v53  ;;  %1179 = vmatprep.subr.bf16.mxu0 %v1334_v54  ;;  %v1368_v54 = vld [vmem:[#allocation8 + $0x30] sm:$0xff]  }
  0x7a   :  { %1201 = vmatprep.subr.bf16.mxu1 %v1335_v55  ;;  %v1369_v55 = vld [vmem:[#allocation8 + $0x38] sm:$0xff]  }
  0x7c   :  { %1180 = vmatpush3.bf16.msra.mxu0 %v1336_v56  ;;  %v1109_v56 = vld [vmem:[%s1637_s4] ss:$0 sm:$0xff]  ;;  %s1458_s4 = scalar_lea.vmem %s1026_s29, 128 }
  0x7d   :  { %1202 = vmatpush3.bf16.msra.mxu1 %v1337_v57  ;;  %1181 = vmatprep.subr.bf16.mxu0 %v1338_v58  ;;  %p1459_p4 = scmp.ne.s32.totalorder %s1026_s29, %s1458_s4  ;;  %p1464_p6 = scmp.lt.s32.totalorder %s1458_s4, %s1458_s4 }
  0x7e   :  { %1203 = vmatprep.subr.bf16.mxu1 %v1339_v59 }
  0x7f   :  { %p1465_p7 = por %p1464_p6, %p1463_p5 }
  0x80   :  { %1182 = vmatpush3.bf16.msra.mxu0 %v1340_v60 }
  0x81   :  { %1204 = vmatpush3.bf16.msra.mxu1 %v1341_v61  ;;  %1183 = vmatprep.subr.bf16.mxu0 %v1342_v62  ;;  %p1466_p8 = pnand %p1465_p7, %p1459_p4 }
  0x82   :  { %1205 = vmatprep.subr.bf16.mxu1 %v1343_v63 }
  0x84   :  { %1184 = vmatpush3.bf16.msra.mxu0 %v1344_v0  ;;  %v1118_v0 = vld [vmem:[%s1639_s6] ss:$0 sm:$0xff] }
  0x85   :  { %1206 = vmatpush3.bf16.msra.mxu1 %v1345_v1  ;;  %1185 = vmatprep.subr.bf16.mxu0 %v1346_v2 }
  0x86   :  { %1207 = vmatprep.subr.bf16.mxu1 %v1347_v3 }
  0x88   :  { %1186 = vmatpush3.bf16.msra.mxu0 %v1348_v4 }
  0x89   :  { %1208 = vmatpush3.bf16.msra.mxu1 %v1349_v5  ;;  %1233 = vmatprep.subr.bf16.mxu0 %v1494_v13 }
  0x8a   :  { %1253 = vmatprep.subr.bf16.mxu1 %v1494_v13 }
  0x8b   :  { %745 = vmatmul.mubr.bf16.vlgmr.msra.gmra.mrb[4].mxu0 %v1041_v7 }
  0x8c   :  { %785 = vmatmul.mubr.bf16.vlgmr.msra.gmra.mrb[4].mxu1 %v1043_v10  ;;  %1234 = vmatpush3.bf16.msra.mxu0 %v1354_v12 }
  0x8d   :  { %1235 = vmatprep.subr.bf16.mxu0 %v1494_v13  ;;  %1249 = vmatprep.mubr.msk.bf16.mxu0 %vm1495_vm0, %v1494_v13 }
  0x8e   :  { %1269 = vmatprep.mubr.msk.bf16.mxu1 %vm1495_vm0, %v1494_v13  ;;  %1254 = vmatpush3.bf16.msra.mxu1 %v1362_v21 }
  0x8f   :  { %1255 = vmatprep.subr.bf16.mxu1 %v1494_v13 }
  0x90   :  { %1236 = vmatpush3.bf16.msra.mxu0 %v1355_v14 }
  0x91   :  { %1237 = vmatprep.subr.bf16.mxu0 %v1494_v13 }
  0x92   :  { %1256 = vmatpush3.bf16.msra.mxu1 %v1363_v22 }
  0x93   :  { %1257 = vmatprep.subr.bf16.mxu1 %v1494_v13 }
  0x94   :  { %1238 = vmatpush3.bf16.msra.mxu0 %v1356_v15 }
  0x95   :  { %1239 = vmatprep.subr.bf16.mxu0 %v1494_v13 }
  0x96   :  { %1258 = vmatpush3.bf16.msra.mxu1 %v1364_v23 }
  0x97   :  { %1259 = vmatprep.subr.bf16.mxu1 %v1494_v13 }
  0x98   :  { %1240 = vmatpush3.bf16.msra.mxu0 %v1357_v16 }
  0x99   :  { %1241 = vmatprep.subr.bf16.mxu0 %v1494_v13 }
  0x9a   :  { %1260 = vmatpush3.bf16.msra.mxu1 %v1365_v24 }
  0x9b   :  { %1261 = vmatprep.subr.bf16.mxu1 %v1494_v13 }
  0x9c   :  { %1242 = vmatpush3.bf16.msra.mxu0 %v1358_v17 }
  0x9d   :  { %1243 = vmatprep.subr.bf16.mxu0 %v1494_v13 }
  0x9e   :  { %1262 = vmatpush3.bf16.msra.mxu1 %v1366_v25 }
  0x9f   :  { %1263 = vmatprep.subr.bf16.mxu1 %v1494_v13 }
  0xa0   :  { %1244 = vmatpush3.bf16.msra.mxu0 %v1359_v18 }
  0xa1   :  { %1245 = vmatprep.subr.bf16.mxu0 %v1494_v13 }
  0xa2   :  { %1264 = vmatpush3.bf16.msra.mxu1 %v1367_v26 }
  0xa3   :  { %1265 = vmatprep.subr.bf16.mxu1 %v1494_v13 }
  0xa4   :  { %1246 = vmatpush3.bf16.msra.mxu0 %v1360_v19 }
  0xa5   :  { %1247 = vmatprep.subr.bf16.mxu0 %v1494_v13 }
  0xa6   :  { %1266 = vmatpush3.bf16.msra.mxu1 %v1368_v54 }
  0xa7   :  { %1267 = vmatprep.subr.bf16.mxu1 %v1494_v13 }
  0xa8   :  { %1248 = vmatpush3.bf16.msra.mxu0 %v1361_v20 }
  0xaa   :  { %1268 = vmatpush3.bf16.msra.mxu1 %v1369_v55 }
 0x13e   :  { %v1143_v27 = vpop.f32.mrb[0].mxu0 }
 0x13f   :  { %v1165_v28 = vpop.f32.mrb[0].mxu1  ;;  %v1144_v30 = vpop.f32.mrb[1].mxu0 }
 0x140   :  { %v1166_v31 = vpop.f32.mrb[1].mxu1  ;;  %v1145_v32 = vadd.f32 %v1144_v30, %v1143_v27  ;;  %v1146_v34 = vpop.f32.mrb[2].mxu0 }
 0x141   :  { %v1167_v33 = vadd.f32 %v1166_v31, %v1165_v28  ;;  %v1168_v35 = vpop.f32.mrb[2].mxu1  ;;  %v1147_v36 = vpop.f32.mrb[3].mxu0 }
 0x142   :  { %v1169_v37 = vpop.f32.mrb[3].mxu1  ;;  %v667_v38 = vadd.f32 %v1145_v32, %v1036_v29 }
 0x144   :  { %v707_v39 = vadd.f32 %v1167_v33, %v667_v38 }
 0x15e   :  { %v1187_v40 = vpop.f32.mrb[4].mxu0 }
 0x15f   :  { %v1209_v41 = vpop.f32.mrb[4].mxu1  ;;  %v1188_v42 = vpop.f32.mrb[5].mxu0 }
 0x160   :  { %v1210_v43 = vpop.f32.mrb[5].mxu1  ;;  %v1189_v44 = vadd.f32 %v1188_v42, %v1187_v40  ;;  %v1190_v46 = vpop.f32.mrb[6].mxu0 }
 0x161   :  { %v1211_v45 = vadd.f32 %v1210_v43, %v1209_v41  ;;  %v1212_v47 = vpop.f32.mrb[6].mxu1  ;;  %v1191_v48 = vpop.f32.mrb[7].mxu0 }
 0x162   :  { %v1213_v49 = vpop.f32.mrb[7].mxu1  ;;  %v747_v50 = vadd.f32 %v1189_v44, %v707_v39 }
 0x164   :  { %v787_v51 = vadd.f32 %v1211_v45, %v747_v50 }
 0x166   :  { %v792_v52 = vmax.f32 %v787_v51, 0.0 }
 0x168   :  { %v793_v53 = vpack.c.bf16 %v792_v52, %v792_v52 }
 0x16a   :  { %1250 = vmatmul.mubr.bf16.vlgmr.msra.gmra.mrb[8].mxu0 %v793_v53 }
 0x23d   :  { %v899_v57 = vpop.f32.mrb[8].mxu0 }
 0x23e   :  { %v900_v58 = vadd.f32 %v1109_v56, %v899_v57  ;;  %v1251_v59 = vpop.f32.mrb[9].mxu0 }
 0x23f   :  { %v902_v60 = vpop.f32.mrb[10].mxu0 }
 0x240   :  { %v905_v61 = vmax.f32 %v900_v58, 0.0  ;;  %v1252_v62 = vpop.f32.mrb[11].mxu0 }
 0x242   :  { %v906_v63 = vpack.c.bf16 %v905_v61, %v905_v61 }
 0x244   :  { %1270 = vmatmul.mubr.bf16.vlgmr.msra.gmra.mrb[8].mxu1 %v906_v63 }
 0x317   :  { %v1012_v1 = vpop.f32.mrb[8].mxu1 }
 0x318   :  { %v1013_v2 = vadd.f32 %v1118_v0, %v1012_v1  ;;  %v1271_v3 = vpop.f32.mrb[9].mxu1 }
 0x319   :  { %v1015_v4 = vpop.f32.mrb[10].mxu1 }
 0x31a   :  { %1018 = vst [vmem:[#allocation10] sm:$0xff] %v1013_v2  ;;  %v1272_v5 = vpop.f32.mrb[11].mxu1 }
 0x31b   :  { %1469 = shalt.err (!%p1466_p8)
}
 0x31c   :  { %s1470_s6 = scalar_lea.hbm %s1640_s7, 128 }
 0x31d   :  { %p1471_p9 = scmp.ne.s32.totalorder %s1640_s7, %s1470_s6  ;;  %p1474_p10 = scmp.lt.u32.totalorder %s1470_s6, %s1640_s7 }
 0x31f   :  { %p1476_p11 = pnand %p1474_p10, %p1471_p9 }
 0x321   :  { %1479 = shalt.err (!%p1476_p11)
}
 0x322   :  { %1028 = dma.vmem_to_hbm [thread:$0]  %s1026_s29, 128, %s1640_s7, [#allocation4]  }
 0x323   :  { %1486 = dma.done.wait [#allocation4], 128  }
 0x324   :  { %1487 = vsyncadd [#allocation4], 4294967168 }
 0x325   :  { %1032 = vsyncpa [#allocation3], 1 }
 0x326   :  { %1033 = vsyncpa [#allocation6], 1 }
 0x327   :  { %1034 = vsyncpa [#allocation9], 1 }
 0x328   :  { %1035 = vsyncpa [#allocation4], 1 }

</bundles_post_ra>
